<compile_context>
chip_gen: v6e
topology: v6e:2x2x1
jax: 0.10.0
libtpu: 0.0.40
codegen_flags: <defaults>
</compile_context>

<pallas_src>
import functools

import jax
import jax.numpy as jnp
from jax.experimental import pallas as pl
from jax.experimental.pallas import tpu as pltpu

BN_EPS = 1e-5
LANE = 128
SUBLANE = 8


def _round_up(n, m):
    return ((n + m - 1) // m) * m


# ----------------------------------------------------------------------------
# Kernel
# ----------------------------------------------------------------------------
def dense_vanilla_block_kernel(x_ref, w_ref, p_ref, o_ref, *, block_n):
    """One feature tile of relu(x @ W + b) followed by per-feature batchnorm.

    x_ref: [B, F_in_p]        resident activation (constant index_map)
    w_ref: [F_in_p, block_n]  pre-transposed weight tile (canonical K x N)
    p_ref: [8, F_out_p]       resident param slab; rows 0..2 = bias,gamma,beta
    o_ref: [B, block_n]
    """
    x = x_ref[...]
    w = w_ref[...]
    if x.dtype != w.dtype:
        x = x.astype(w.dtype)  # bf16 MXU inputs; accumulation stays f32

    # Canonical contraction on the MXU, f32 accumulation.
    h = jax.lax.dot_general(
        x, w,
        dimension_numbers=(((1,), (0,)), ((), ())),
        preferred_element_type=jnp.float32,
    )                                                   # [B, TN] f32

    # Slice this tile's params out of the resident slab (lane-aligned offset).
    col = pl.multiple_of(pl.program_id(0) * block_n, LANE)
    p = p_ref[:, pl.ds(col, block_n)]                   # [8, TN] f32
    bias, gamma, beta = p[0:1], p[1:2], p[2:3]

    h = jnp.maximum(h + bias, 0.0)                      # ReLU

    # BatchNorm1d training-mode forward: biased batch stats, single pass
    # (var = E[h^2] - mean^2; no `centered` tile materialized).
    inv_n = 1.0 / h.shape[0]
    sum_h = jnp.sum(h, axis=0, keepdims=True)
    sum_h2 = jnp.sum(h * h, axis=0, keepdims=True)
    mean = sum_h * inv_n
    var = jnp.maximum(sum_h2 * inv_n - mean * mean, 0.0)
    inv_std = jax.lax.rsqrt(var + BN_EPS)

    # Fold the BN affine into one per-feature scale/shift.
    scale = gamma * inv_std
    shift = beta - mean * scale
    o_ref[...] = (h * scale + shift).astype(o_ref.dtype)


# ----------------------------------------------------------------------------
# Parameter prep (one-time, "init" cost)
# ----------------------------------------------------------------------------
def prepare_params(weight, bias, gamma, beta, matmul_dtype=jnp.bfloat16):
    """weight: [F_out, F_in] (PyTorch Linear layout); bias/gamma/beta: [F_out].

    Returns:
      weight_t : [F_in_p, F_out_p] in `matmul_dtype` (pre-transposed + padded)
      params   : [8, F_out_p] f32 slab (rows: bias, gamma, beta, zeros)
      f_out    : true number of output features
    """
    F_out, F_in = weight.shape
    F_out_p = _round_up(F_out, LANE)
    F_in_p = _round_up(F_in, LANE)
    weight_t = jnp.pad(weight, ((0, F_out_p - F_out), (0, F_in_p - F_in))).T
    weight_t = weight_t.astype(matmul_dtype)            # [F_in_p, F_out_p]
    pad = F_out_p - F_out
    bias = jnp.pad(bias.astype(jnp.float32), (0, pad))
    gamma = jnp.pad(gamma.astype(jnp.float32), (0, pad))
    beta = jnp.pad(beta.astype(jnp.float32), (0, pad))
    params = jnp.pad(jnp.stack([bias, gamma, beta], axis=0),
                     ((0, SUBLANE - 3), (0, 0)))         # [8, F_out_p]
    return weight_t, params, F_out


# ----------------------------------------------------------------------------
# Generation-aware tiling
# ----------------------------------------------------------------------------
def _vmem_info():
    cap = 64 << 20  # conservative fallback = v7x per-core VMEM
    try:
        cap = int(getattr(pltpu.get_tpu_info(), "vmem_capacity_bytes", cap))
    except Exception:
        pass
    budget = (cap * 3) // 4  # leave headroom for compiler-internal scratch
    return budget, cap


def _select_tiling(B, F_in_p, F_out_p, x_bytes, w_bytes, budget):
    def footprint(tn, w_bufs):
        return (2 * B * F_in_p * x_bytes          # resident x (default 2 bufs)
                + w_bufs * F_in_p * tn * w_bytes  # streamed weight tiles
                + 2 * SUBLANE * F_out_p * 4       # resident param slab
                + 2 * B * tn * 4                  # output double buffer
                + 2 * B * tn * 4)                 # f32 h / elementwise temps

    candidates = [tn for tn in (1024, 512, 256, 128) if F_out_p % tn == 0]
    fitting = [tn for tn in candidates if footprint(tn, 2) <= budget] \
        or [candidates[-1]]
    # Prefer >=2 grid steps so the "parallel" feature axis can shard across
    # the two TensorCores of a v7x chip.
    multi = [tn for tn in fitting if F_out_p // tn >= 2]
    block_n = multi[0] if multi else fitting[0]
    # Deeper weight buffering when the grid is long enough and VMEM allows.
    w_bufs = 3 if (F_out_p // block_n >= 3
                   and footprint(block_n, 3) <= budget) else 2
    return block_n, w_bufs, footprint(block_n, w_bufs)


# ----------------------------------------------------------------------------
# Wrapper
# ----------------------------------------------------------------------------
@functools.partial(jax.jit, static_argnames=("f_out",))
def dense_vanilla_block(x, weight_t, params, f_out):
    """x: [B, F_in]; weight_t: [F_in_p, F_out_p]; params: [8, F_out_p]."""
    B, F_in = x.shape
    F_in_p, F_out_p = weight_t.shape

    # Zero-pad the contraction axis once so x / W loads stay lane-dense.
    if F_in_p != F_in:
        x = jnp.pad(x, ((0, 0), (0, F_in_p - F_in)))

    budget, _cap = _vmem_info()
    block_n, w_bufs, needed = _select_tiling(
        B, F_in_p, F_out_p, x.dtype.itemsize, weight_t.dtype.itemsize, budget)
    if needed > budget:
        # TODO(synk): for very large B, add a batch grid axis with scratch
        # sum/sum^2 accumulators + a second normalization pass instead of
        # holding the full batch in VMEM.
        raise ValueError(
            f"batch too large for single-tile BN stats: needs ~{needed >> 20} "
            f"MiB VMEM, budget {budget >> 20} MiB")

    grid = (F_out_p // block_n,)
    w_spec_kwargs = {}
    if w_bufs == 3:
        w_spec_kwargs["pipeline_mode"] = pl.Buffered(3)

    cost = pl.CostEstimate(
        flops=2 * B * F_in_p * F_out_p,
        transcendentals=0,
        bytes_accessed=(x.size * x.dtype.itemsize
                        + weight_t.size * weight_t.dtype.itemsize
                        + params.size * params.dtype.itemsize
                        + B * F_out_p * x.dtype.itemsize),
    )

    out_p = pl.pallas_call(
        functools.partial(dense_vanilla_block_kernel, block_n=block_n),
        out_shape=jax.ShapeDtypeStruct((B, F_out_p), x.dtype),
        grid=grid,
        in_specs=[
            # Resident x (constant index_map -> never re-fetched).
            # TODO(synk): pl.Buffered(1) here would drop x's second (never
            # refilled) buffer; left at the default for compile safety.
            pl.BlockSpec((B, F_in_p), lambda j: (0, 0)),
            # Streamed weight tile in canonical [K, N] layout.
            pl.BlockSpec((F_in_p, block_n), lambda j: (0, j), **w_spec_kwargs),
            # Resident packed bias/gamma/beta slab.
            pl.BlockSpec((SUBLANE, F_out_p), lambda j: (0, 0)),
        ],
        out_specs=pl.BlockSpec((B, block_n), lambda j: (0, j)),
        compiler_params=pltpu.CompilerParams(
            # Feature tiles are independent (BN stats are per-feature).
            dimension_semantics=("parallel",),
            vmem_limit_bytes=budget,
        ),
        cost_estimate=cost,
    )(x, weight_t, params)

    if F_out_p != f_out:
        out_p = out_p[:, :f_out]
    return out_p


# ----------------------------------------------------------------------------
# Reference + demo
# ----------------------------------------------------------------------------
def reference(x, weight, bias, gamma, beta, matmul_dtype=jnp.float32):
    # matmul_dtype=bf16 emulates the kernel's bf16 MXU input rounding (f32 acc)
    # so the bf16 path can be checked apples-to-apples.
    xr = x.astype(matmul_dtype).astype(jnp.float32)
    wr = weight.astype(matmul_dtype).astype(jnp.float32)
    h = jnp.maximum(xr @ wr.T + bias, 0.0)
    mean = jnp.mean(h, axis=0)
    var = jnp.mean((h - mean) ** 2, axis=0)
    return gamma * (h - mean) / jnp.sqrt(var + BN_EPS) + beta


if __name__ == "__main__":
    key = jax.random.PRNGKey(0)
    k_x, k_w, k_b = jax.random.split(key, 3)

    batch = 8
    in_features = 32
    out_features = 64

    x = jax.random.normal(k_x, (batch, in_features), dtype=jnp.float32)

    # Deterministic init mirroring the module's __init__:
    #  - weight: kaiming_normal_(nonlinearity='relu') -> N(0, sqrt(2/fan_in))
    #  - bias:   PyTorch Linear default U(-1/sqrt(fan_in), 1/sqrt(fan_in))
    #  - batch_norm: gamma=1, beta=0
    w_std = (2.0 / in_features) ** 0.5
    weight = w_std * jax.random.normal(
        k_w, (out_features, in_features), dtype=jnp.float32)
    bound = 1.0 / (in_features ** 0.5)
    bias = jax.random.uniform(k_b, (out_features,), minval=-bound,
                              maxval=bound, dtype=jnp.float32)
    gamma = jnp.ones((out_features,), dtype=jnp.float32)
    beta = jnp.zeros((out_features,), dtype=jnp.float32)

    # Default (fast) path: bf16 MXU inputs, f32 accumulation + epilogue.
    w_bf16, params, f_out = prepare_params(
        weight, bias, gamma, beta, matmul_dtype=jnp.bfloat16)
    out_bf16 = dense_vanilla_block(x, w_bf16, params, f_out)

    # f32 path for tight numerical verification of the algorithm.
    w_f32, params_f32, _ = prepare_params(
        weight, bias, gamma, beta, matmul_dtype=jnp.float32)
    out_f32 = dense_vanilla_block(x, w_f32, params_f32, f_out)

    jax.block_until_ready((out_bf16, out_f32))

    ref_f32 = reference(x, weight, bias, gamma, beta, jnp.float32)
    ref_bf16 = reference(x, weight, bias, gamma, beta, jnp.bfloat16)

    assert out_bf16.shape == (batch, out_features)
    assert out_f32.shape == (batch, out_features)
    assert jnp.allclose(out_f32, ref_f32, atol=5e-4, rtol=5e-4), \
        "f32 kernel mismatch vs reference"
    assert jnp.allclose(out_bf16, ref_bf16, atol=5e-3, rtol=5e-3), \
        "bf16 kernel mismatch vs bf16-rounded reference"

    # TODO(synk): running_mean / running_var updates of nn.BatchNorm1d are
    # intentionally not reproduced (forward-only kernel).
    print("KERNEL_OK")
</pallas_src>

<mosaic_0001>
module attributes {stable_mosaic.version = 11 : i64} {
  func.func @dense_vanilla_block_kernel(%arg0: i32, %arg1: memref<8x128xf32, #tpu.memory_space<vmem>>, %arg2: memref<128x128xbf16, #tpu.memory_space<vmem>>, %arg3: memref<8x128xf32, #tpu.memory_space<vmem>>, %arg4: memref<8x128xf32, #tpu.memory_space<vmem>>) attributes {dimension_semantics = [#tpu.dimension_semantics<parallel>], iteration_bounds = array<i64: 1>, scalar_prefetch = 0 : i64, scratch_operands = 0 : i64, tpu.core_type = #tpu.core_type<tc>, window_params = [{pipeline_mode = #tpu.pipeline_mode<synchronous>, transform_indices = @transform_0, window_bounds = array<i64: 8, 128>}, {transform_indices = @transform_1, window_bounds = array<i64: 128, 128>}, {pipeline_mode = #tpu.pipeline_mode<synchronous>, transform_indices = @transform_2, window_bounds = array<i64: 8, 128>}, {transform_indices = @transform_3, window_bounds = array<i64: 8, 128>}]} {
    %c0 = arith.constant 0 : index
    %c0_0 = arith.constant 0 : index
    %0 = vector.load %arg1[%c0, %c0_0] : memref<8x128xf32, #tpu.memory_space<vmem>>, vector<8x128xf32>
    %c0_1 = arith.constant 0 : index
    %c0_2 = arith.constant 0 : index
    %1 = vector.load %arg2[%c0_1, %c0_2] : memref<128x128xbf16, #tpu.memory_space<vmem>>, vector<128x128xbf16>
    %2 = arith.truncf %0 : vector<8x128xf32> to vector<8x128xbf16>
    %cst = arith.constant dense<0.000000e+00> : vector<8x128xf32>
    %3 = tpu.matmul %2, %1, %cst {dimension_numbers = #tpu.dot_dimension_numbers<[1], [0], [0], [1], [0, 0, 1, 1], [], []>} : vector<8x128xbf16>, vector<128x128xbf16>, vector<8x128xf32> -> vector<8x128xf32>
    %c128_i32 = arith.constant 128 : i32
    %4 = arith.muli %arg0, %c128_i32 : i32
    %5 = tpu.assume_multiple %4, 128 : i32
    %c0_3 = arith.constant 0 : index
    %6 = arith.index_cast %5 : i32 to index
    %7 = vector.load %arg3[%c0_3, %6] : memref<8x128xf32, #tpu.memory_space<vmem>>, vector<8x128xf32>
    %8 = vector.extract_strided_slice %7 {offsets = [0, 0], sizes = [1, 128], strides = [1, 1]} : vector<8x128xf32> to vector<1x128xf32>
    %9 = vector.extract_strided_slice %7 {offsets = [1, 0], sizes = [1, 128], strides = [1, 1]} : vector<8x128xf32> to vector<1x128xf32>
    %10 = vector.extract_strided_slice %7 {offsets = [2, 0], sizes = [1, 128], strides = [1, 1]} : vector<8x128xf32> to vector<1x128xf32>
    %11 = vector.broadcast %8 : vector<1x128xf32> to vector<8x128xf32>
    %12 = arith.addf %3, %11 : vector<8x128xf32>
    %cst_4 = arith.constant 0.000000e+00 : f32
    %13 = vector.broadcast %cst_4 : f32 to vector<8x128xf32>
    %14 = arith.maximumf %12, %13 : vector<8x128xf32>
    %cst_5 = arith.constant dense<0.000000e+00> : vector<128xf32>
    %15 = vector.multi_reduction <add>, %14, %cst_5 [0] : vector<8x128xf32> to vector<128xf32>
    %16 = vector.shape_cast %15 : vector<128xf32> to vector<1x128xf32>
    %17 = arith.mulf %14, %14 : vector<8x128xf32>
    %cst_6 = arith.constant dense<0.000000e+00> : vector<128xf32>
    %18 = vector.multi_reduction <add>, %17, %cst_6 [0] : vector<8x128xf32> to vector<128xf32>
    %19 = vector.shape_cast %18 : vector<128xf32> to vector<1x128xf32>
    %cst_7 = arith.constant 1.250000e-01 : f32
    %20 = vector.broadcast %cst_7 : f32 to vector<1x128xf32>
    %21 = arith.mulf %16, %20 : vector<1x128xf32>
    %cst_8 = arith.constant 1.250000e-01 : f32
    %22 = vector.broadcast %cst_8 : f32 to vector<1x128xf32>
    %23 = arith.mulf %19, %22 : vector<1x128xf32>
    %24 = arith.mulf %21, %21 : vector<1x128xf32>
    %25 = arith.subf %23, %24 : vector<1x128xf32>
    %cst_9 = arith.constant 0.000000e+00 : f32
    %26 = vector.broadcast %cst_9 : f32 to vector<1x128xf32>
    %27 = arith.maximumf %25, %26 : vector<1x128xf32>
    %cst_10 = arith.constant 9.99999974E-6 : f32
    %28 = vector.broadcast %cst_10 : f32 to vector<1x128xf32>
    %29 = arith.addf %27, %28 : vector<1x128xf32>
    %30 = math.rsqrt %29 : vector<1x128xf32>
    %31 = arith.mulf %9, %30 : vector<1x128xf32>
    %32 = arith.mulf %21, %31 : vector<1x128xf32>
    %33 = arith.subf %10, %32 : vector<1x128xf32>
    %34 = vector.broadcast %31 : vector<1x128xf32> to vector<8x128xf32>
    %35 = arith.mulf %14, %34 : vector<8x128xf32>
    %36 = vector.broadcast %33 : vector<1x128xf32> to vector<8x128xf32>
    %37 = arith.addf %35, %36 : vector<8x128xf32>
    %c0_11 = arith.constant 0 : index
    %c0_12 = arith.constant 0 : index
    %38 = vector.load %arg4[%c0_11, %c0_12] : memref<8x128xf32, #tpu.memory_space<vmem>>, vector<8x128xf32>
    tpu.vector_store %arg4[%c0_11, %c0_12], %37 {strides = array<i32>} : memref<8x128xf32, #tpu.memory_space<vmem>>, vector<8x128xf32>,
    return
  }
  func.func @transform_0(%arg0: i32) -> (i32, i32) {
    %c0_i32 = arith.constant 0 : i32
    %c0_i32_0 = arith.constant 0 : i32
    %c0_i32_1 = arith.constant 0 : i32
    return %c0_i32, %c0_i32_0 : i32, i32
  }
  func.func @transform_1(%arg0: i32) -> (i32, i32) {
    %c0_i32 = arith.constant 0 : i32
    %c0_i32_0 = arith.constant 0 : i32
    return %c0_i32, %arg0 : i32, i32
  }
  func.func @transform_2(%arg0: i32) -> (i32, i32) {
    %c0_i32 = arith.constant 0 : i32
    %c0_i32_0 = arith.constant 0 : i32
    %c0_i32_1 = arith.constant 0 : i32
    return %c0_i32, %c0_i32_0 : i32, i32
  }
  func.func @transform_3(%arg0: i32) -> (i32, i32) {
    %c0_i32 = arith.constant 0 : i32
    %c0_i32_0 = arith.constant 0 : i32
    return %c0_i32, %arg0 : i32, i32
  }
}

</mosaic_0001>

<bundles_post_ra>
// kernel: dense_vanilla_block.1
= control target key start
LH: loop header
LB: loop body
LE: loop exit
PB: predicated region body
PF: predicated region fallthrough
CT: control target
= control target key end

     0   :  { %8 = vsyncpa [#allocation3], 0  ;;  %s334_s0 = inlined_call_operand.vmem [shape: f32[8,128], index: 0, kind: input, shape index: {}]   ;;  %s335_s1 = inlined_call_operand.hbm [shape: bf16[128,128], index: 1, kind: input, shape index: {}]   ;;  %s336_s2 = inlined_call_operand.vmem [shape: f32[8,128], index: 2, kind: input, shape index: {}]   ;;  %s337_s3 = inlined_call_operand.hbm [shape: f32[8,128], index: 3, kind: output, shape index: {}]  }
   0x1   :  { %9 = vsyncpa [#allocation4], 0  ;;  %s296_s12 = smov [#allocation2]  }
   0x2   :  { %s17_s13 = sshll.u32 %s296_s12, 4  ;;  %s18_s13 = int_to_ptr.vmem [resolvable:$true] %s17_s13 }
   0x3   :  { %s260_s14 = scalar_lea.vmem %s18_s13, 1024  ;;  %p265_p1 = scmp.lt.s32.totalorder %s18_s13, %s18_s13 }
   0x4   :  { %p261_p0 = scmp.ne.s32.totalorder %s18_s13, %s260_s14  ;;  %p266_p2 = scmp.lt.s32.totalorder %s260_s14, %s260_s14 }
   0x6   :  { %p267_p3 = por %p266_p2, %p265_p1 }
   0x8   :  { %p268_p4 = pnand %p267_p3, %p261_p0 }
   0xa   :  { %271 = shalt.err (!%p268_p4)
}
   0xb   :  { %s297_s15 = smov 64   ;;  %s298_s16 = smov 4  }
   0xc   :  { %23 = dma.hbm_to_vmem [thread:$0]  %s335_s1, 1024, %s18_s13, [#allocation3], %s297_s15, %s297_s15, %s298_s16  }
   0xd   :  { %292 = dma.done.wait [#allocation3], 1024  }
   0xe   :  { %293 = vsyncadd [#allocation3], 4294966272  ;;  %v299_v0 = vmov 0.0   ;;  %vm300_vm0 = vmmov 0   ;;  %v242_v1 = vld [vmem:[#allocation2 + $0x38] sm:$0xff]   ;;  %v243_v2 = vld [vmem:[#allocation2 + $0x30] sm:$0xff]   ;;  %v53_v11 = vlaneseq }
   0xf   :  { %216 = vmatprep.subr.bf16.mxu0 %v299_v0  ;;  %232 = vmatprep.mubr.msk.bf16.mxu0 %vm300_vm0, %v299_v0  ;;  %v244_v3 = vld [vmem:[#allocation2 + $0x28] sm:$0xff]   ;;  %v245_v4 = vld [vmem:[#allocation2 + $0x20] sm:$0xff]   ;;  %v246_v5 = vld [vmem:[#allocation2 + $0x18] sm:$0xff]  }
  0x10   :  { %217 = vmatpush3.bf16.msra.mxu0 %v242_v1  ;;  %v247_v6 = vld [vmem:[#allocation2 + $0x10] sm:$0xff]   ;;  %v248_v7 = vld [vmem:[#allocation2 + $0x8] sm:$0xff]   ;;  %v249_v8 = vld [vmem:[#allocation2] sm:$0xff]   ;;  %v54_v12 = vshrl.u32 %v53_v11, 7 }
  0x11   :  { %218 = vmatprep.subr.bf16.mxu0 %v299_v0  ;;  %v30_v9 = vld [vmem:[%s334_s0] sm:$0xff]  ;;  %s301_s0 = smov [#allocation5]  }
  0x12   :  { %v47_v10 = vpack.c.bf16 %v30_v9, %v30_v9  ;;  %v55_v13 = vsub.s32 0, %v54_v12  ;;  %v52_v14 = vld [vmem:[%s336_s2] sm:$0xff]  ;;  %v174_v43 = vsub.s32 1, %v54_v12  ;;  %v179_v47 = vsub.s32 2, %v54_v12  ;;  %s189_s2 = sshll.u32 %s301_s0, 4  ;;  %s190_s2 = int_to_ptr.vmem [resolvable:$true] %s189_s2 }
  0x13   :  { %s272_s22 = scalar_lea.vmem %s190_s2, 128  ;;  %p277_p6 = scmp.lt.s32.totalorder %s190_s2, %s190_s2 }
  0x14   :  { %219 = vmatpush3.bf16.msra.mxu0 %v243_v2  ;;  %v56_v15 = vrot.slane %v52_v14, %v55_v13  ;;  %p273_p5 = scmp.ne.s32.totalorder %s190_s2, %s272_s22  ;;  %p278_p7 = scmp.lt.s32.totalorder %s272_s22, %s272_s22 }
  0x15   :  { %220 = vmatprep.subr.bf16.mxu0 %v299_v0 }
  0x16   :  { %p279_p8 = por %p278_p7, %p277_p6 }
  0x18   :  { %221 = vmatpush3.bf16.msra.mxu0 %v244_v3  ;;  %p280_p9 = pnand %p279_p8, %p273_p5 }
  0x19   :  { %222 = vmatprep.subr.bf16.mxu0 %v299_v0 }
  0x1c   :  { %223 = vmatpush3.bf16.msra.mxu0 %v245_v4 }
  0x1d   :  { %224 = vmatprep.subr.bf16.mxu0 %v299_v0 }
  0x20   :  { %225 = vmatpush3.bf16.msra.mxu0 %v246_v5 }
  0x21   :  { %226 = vmatprep.subr.bf16.mxu0 %v299_v0 }
  0x24   :  { %227 = vmatpush3.bf16.msra.mxu0 %v247_v6 }
  0x25   :  { %228 = vmatprep.subr.bf16.mxu0 %v299_v0 }
  0x28   :  { %229 = vmatpush3.bf16.msra.mxu0 %v248_v7 }
  0x29   :  { %230 = vmatprep.subr.bf16.mxu0 %v299_v0 }
  0x2c   :  { %231 = vmatpush3.bf16.msra.mxu0 %v249_v8 }
  0x2f   :  { %233 = vmatmul.mubr.bf16.vlgmr.msra.gmra.mxu0 %v47_v10 }
  0xef   :  { %v139_v16 = vpop.f32.mrf.mxu0 }
  0xf0   :  { %v140_v17 = vadd.f32 %v139_v16, %v56_v15 }
  0xf1   :  { %v234_v18 = vpop.f32.mrf.mxu0 }
  0xf2   :  { %v145_v19 = vmax.f32 %v140_v17, 0.0 }
  0xf3   :  { %v142_v20 = vpop.f32.mrf.mxu0 }
  0xf4   :  { %v146_v21 = vrot.slane %v145_v19, 4  ;;  %v152_v22 = vmul.f32 %v145_v19, %v145_v19 }
  0xf5   :  { %v235_v23 = vpop.f32.mrf.mxu0 }
  0xf6   :  { %v147_v24 = vadd.f32 %v146_v21, %v145_v19  ;;  %v153_v25 = vrot.slane %v152_v22, 4 }
  0xf8   :  { %v148_v26 = vrot.slane %v147_v24, 2  ;;  %v154_v27 = vadd.f32 %v153_v25, %v152_v22 }
  0xfa   :  { %v149_v28 = vadd.f32 %v148_v26, %v147_v24  ;;  %v155_v29 = vrot.slane %v154_v27, 2 }
  0xfc   :  { %v150_v30 = vrot.slane %v149_v28, 1  ;;  %v156_v31 = vadd.f32 %v155_v29, %v154_v27 }
  0xfe   :  { %v151_v32 = vadd.f32 %v150_v30, %v149_v28  ;;  %v157_v33 = vrot.slane %v156_v31, 1 }
 0x100   :  { %v158_v34 = vadd.f32 %v157_v33, %v156_v31  ;;  %v159_v35 = vmul.f32 0.125, %v151_v32 }
 0x102   :  { %v160_v36 = vmul.f32 0.125, %v158_v34  ;;  %v161_v37 = vmul.f32 %v159_v35, %v159_v35 }
 0x104   :  { %v162_v38 = vsub.f32 %v160_v36, %v161_v37 }
 0x106   :  { %v163_v39 = vmax.f32 %v162_v38, 0.0 }
 0x108   :  { %v164_v40 = vadd.f32 1e-05, %v163_v39 }
 0x10a   :  { %250 = vrsqrt.f32 %v164_v40 }
 0x117   :  { %v251_v41 = vpop.eup %250 }
 0x118   :  { %v166_v42 = vmul.f32 %v251_v41, %v52_v14 }
 0x11a   :  { %v167_v44 = vmul.f32 %v166_v42, %v159_v35  ;;  %v175_v46 = vrot.slane %v166_v42, %v174_v43 }
 0x11c   :  { %v169_v45 = vrot.slane %v167_v44, 7  ;;  %v176_v49 = vmul.f32 %v175_v46, %v145_v19 }
 0x11e   :  { %v171_v48 = vsub.f32 %v52_v14, %v169_v45 }
 0x120   :  { %v180_v50 = vrot.slane %v171_v48, %v179_v47 }
 0x122   :  { %v181_v51 = vadd.f32 %v180_v50, %v176_v49 }
 0x124   :  { %182 = vst [vmem:[#allocation5] sm:$0xff] %v181_v51 }
 0x125   :  { %283 = shalt.err (!%p280_p9)
}
 0x126   :  { %192 = dma.vmem_to_hbm [thread:$0]  %s190_s2, 128, %s337_s3, [#allocation4]  }
 0x127   :  { %294 = dma.done.wait [#allocation4], 128  }
 0x128   :  { %295 = vsyncadd [#allocation4], 4294967168 }
 0x129   :  { %196 = vsyncpa [#allocation3], 1 }
 0x12a   :  { %197 = vsyncpa [#allocation4], 1 }

</bundles_post_ra>
